<compile_context>
chip_gen: v6e
topology: v6e:2x2x1
jax: 0.10.0
libtpu: 0.0.40
codegen_flags: <defaults>
</compile_context>

<pallas_src>
import jax
import jax.numpy as jnp
from jax import lax
from jax.experimental import pallas as pl
from jax.experimental.pallas import tpu as pltpu

INPUT_DIM = 3
_FOLD = 8                    # sublanes per channel group after folding
_CHUNK_COLS = 1024           # lanes per strip-mined chunk inside the kernel
_MAX_TILE_COLS = 32768       # 24*32768*4B = 3 MiB per buffer (12 MiB dbl-buffered)
_TARGET_GRID_STEPS = 8       # keep >= 8 grid steps so both TCs get work


def _round_up(x, m):
    return (x + m - 1) // m * m


def _pick_tile_cols(cols):
    """Pick the folded-column tile width from a VMEM budget / grid-step target."""
    if cols <= _CHUNK_COLS:
        return cols                                   # single full-extent block
    target = _round_up(-(-cols // _TARGET_GRID_STEPS), _CHUNK_COLS)
    tile = min(_MAX_TILE_COLS, max(_CHUNK_COLS, target))
    return min(tile, (cols // _CHUNK_COLS) * _CHUNK_COLS)


def _make_fused_kernel(tile_cols, chunk):
    """3x3 affine on the folded (24, tile_cols) layout, strip-mined by `chunk`."""
    num_chunks = tile_cols // chunk

    def affine_chunk(w_ref, b_ref, x_ref, out_ref, j0):
        # Rows [8c, 8c+8) of the block hold channel c for 8*chunk samples.
        x0 = x_ref[0:8, pl.ds(j0, chunk)].astype(jnp.float32)
        x1 = x_ref[8:16, pl.ds(j0, chunk)].astype(jnp.float32)
        x2 = x_ref[16:24, pl.ds(j0, chunk)].astype(jnp.float32)
        for jout in range(INPUT_DIM):
            acc = x0 * w_ref[jout, 0]
            acc = acc + x1 * w_ref[jout, 1]
            acc = acc + x2 * w_ref[jout, 2]
            acc = acc + b_ref[jout]
            out_ref[8 * jout:8 * (jout + 1), pl.ds(j0, chunk)] = acc.astype(
                out_ref.dtype)

    def kernel(w_ref, b_ref, x_ref, out_ref):
        # w_ref : SMEM (3, 3) == W_eff^T (row j = weights for output channel j)
        # b_ref : SMEM (3,)   == b_eff
        # x_ref / out_ref : VMEM (24, tile_cols), sublane-folded channel-major
        if num_chunks == 1:
            affine_chunk(w_ref, b_ref, x_ref, out_ref, 0)
        else:
            def body(c, carry):
                j0 = pl.multiple_of(c * chunk, 128)
                affine_chunk(w_ref, b_ref, x_ref, out_ref, j0)
                return carry
            lax.fori_loop(0, num_chunks, body, 0, unroll=num_chunks <= 8)

    return kernel


def linear_model_forward(obs_traj, w1, b1, w2, b2, *, tile_cols=None, chunk=None):
    """obs_traj: (obs_len, batch, 3) -> (obs_len, batch, 3).

    Weights are (in_features, out_features) = torch weight transposed.
    """
    obs_len, batch, in_dim = obs_traj.shape
    assert in_dim == INPUT_DIM
    n = obs_len * batch
    out_dtype = obs_traj.dtype

    # Fuse the two linears (3 -> H -> 3 collapses to a single 3x3 affine map).
    w1f = w1.astype(jnp.float32)
    w2f = w2.astype(jnp.float32)
    w_eff = jnp.dot(w1f, w2f, preferred_element_type=jnp.float32)          # (3, 3)
    b_eff = (jnp.dot(b1.astype(jnp.float32), w2f,
                     preferred_element_type=jnp.float32)
             + b2.astype(jnp.float32))                                     # (3,)
    w_eff_t = w_eff.T   # out = x @ W_eff  <=>  per-channel rows of W_eff^T

    # Channel-major, sublane-folded layout:
    #   (N,3) -> (3,N_pad8) -> (3,8,C) -> (24,C), C = N_pad8 // 8.
    n_pad = _round_up(n, _FOLD)
    x_t = obs_traj.reshape(n, in_dim).T                                    # (3, N)
    if n_pad != n:
        x_t = jnp.pad(x_t, ((0, 0), (0, n_pad - n)))
    cols = n_pad // _FOLD
    x_folded = x_t.reshape(in_dim, _FOLD, cols).reshape(in_dim * _FOLD, cols)

    if tile_cols is None:
        tile_cols = _pick_tile_cols(cols)
    if chunk is None:
        chunk = min(_CHUNK_COLS, tile_cols)
    assert tile_cols % chunk == 0
    grid = (pl.cdiv(cols, tile_cols),)

    itemsize_in = jnp.dtype(obs_traj.dtype).itemsize
    itemsize_out = jnp.dtype(out_dtype).itemsize
    block_in = in_dim * _FOLD * tile_cols * itemsize_in
    block_out = in_dim * _FOLD * tile_cols * itemsize_out
    # Double-buffered in + out, plus headroom; safe on v5e/v6e/v7x.
    vmem_limit = int(min(64 << 20, max(32 << 20,
                                       2 * (block_in + block_out) + (8 << 20))))

    out_folded = pl.pallas_call(
        _make_fused_kernel(tile_cols, chunk),
        out_shape=jax.ShapeDtypeStruct((in_dim * _FOLD, cols), out_dtype),
        grid=grid,
        in_specs=[
            pl.BlockSpec(memory_space=pltpu.MemorySpace.SMEM),     # W_eff^T (3,3)
            pl.BlockSpec(memory_space=pltpu.MemorySpace.SMEM),     # b_eff  (3,)
            pl.BlockSpec((in_dim * _FOLD, tile_cols), lambda i: (0, i)),
        ],
        out_specs=pl.BlockSpec((in_dim * _FOLD, tile_cols), lambda i: (0, i)),
        compiler_params=pltpu.CompilerParams(
            dimension_semantics=("parallel",),
            vmem_limit_bytes=vmem_limit),
        cost_estimate=pl.CostEstimate(
            flops=18 * n,
            transcendentals=0,
            bytes_accessed=3 * n * (itemsize_in + itemsize_out)),
    )(w_eff_t, b_eff, x_folded)

    # Undo the fold / relayout and strip the padded samples.
    out_t = out_folded.reshape(in_dim, _FOLD, cols).reshape(in_dim, n_pad)
    out2d = out_t[:, :n].T                                                 # (N, 3)
    return out2d.reshape(obs_len, batch, in_dim)


def init_params(key, h_dim):
    """Deterministic init mimicking torch.nn.Linear's U(-1/sqrt(fan_in), ...)."""
    k1, k2, k3, k4 = jax.random.split(key, 4)
    bound1 = 1.0 / (INPUT_DIM ** 0.5)
    bound2 = 1.0 / (h_dim ** 0.5)
    # Stored as (in_features, out_features) = torch weight transposed.
    w1 = jax.random.uniform(k1, (INPUT_DIM, h_dim), jnp.float32, -bound1, bound1)
    b1 = jax.random.uniform(k2, (h_dim,), jnp.float32, -bound1, bound1)
    w2 = jax.random.uniform(k3, (h_dim, INPUT_DIM), jnp.float32, -bound2, bound2)
    b2 = jax.random.uniform(k4, (INPUT_DIM,), jnp.float32, -bound2, bound2)
    return w1, b1, w2, b2


if __name__ == "__main__":
    seq_len = 8
    batch = 2
    h_dim = 64  # module default

    key = jax.random.PRNGKey(0)
    k_params, k_x1, k_x2 = jax.random.split(key, 3)
    w1, b1, w2, b2 = init_params(k_params, h_dim)

    def reference(x):
        x2d = x.reshape(-1, INPUT_DIM)
        return ((x2d @ w1 + b1) @ w2 + b2).reshape(x.shape)

    # Case 1: module-default tiny shape (single full-extent block, one chunk).
    obs_traj = jax.random.normal(k_x1, (seq_len, batch, INPUT_DIM), jnp.float32)
    out = jax.block_until_ready(linear_model_forward(obs_traj, w1, b1, w2, b2))
    assert out.shape == (seq_len, batch, INPUT_DIM)
    assert jnp.allclose(out, reference(obs_traj), atol=1e-4, rtol=1e-4)

    # Case 2: small-but-multi-block shape exercising the strip-mined fori_loop
    # body, the multi-step parallel grid and the ragged last tile (~50 KiB).
    obs2 = jax.random.normal(k_x2, (seq_len, 520, INPUT_DIM), jnp.float32)
    out2 = jax.block_until_ready(
        linear_model_forward(obs2, w1, b1, w2, b2, tile_cols=256, chunk=128))
    assert out2.shape == obs2.shape
    assert jnp.allclose(out2, reference(obs2), atol=1e-4, rtol=1e-4)

    print("KERNEL_OK")
</pallas_src>

<mosaic_0001>
module attributes {stable_mosaic.version = 11 : i64} {
  func.func @kernel(%arg0: i32, %arg1: memref<3x3xf32, #tpu.memory_space<smem>>, %arg2: memref<3xf32, #tpu.memory_space<smem>>, %arg3: memref<24x2xf32, #tpu.memory_space<vmem>>, %arg4: memref<24x2xf32, #tpu.memory_space<vmem>>) attributes {dimension_semantics = [#tpu.dimension_semantics<parallel>], iteration_bounds = array<i64: 1>, scalar_prefetch = 0 : i64, scratch_operands = 0 : i64, tpu.core_type = #tpu.core_type<tc>, window_params = [{transform_indices = @transform_0, window_bounds = array<i64: 3, 3>}, {transform_indices = @transform_1, window_bounds = array<i64: 3>}, {transform_indices = @transform_2, window_bounds = array<i64: 24, 2>}, {transform_indices = @transform_3, window_bounds = array<i64: 24, 2>}]} {
    %c0 = arith.constant 0 : index
    %c0_0 = arith.constant 0 : index
    %0 = vector.load %arg3[%c0, %c0_0] : memref<24x2xf32, #tpu.memory_space<vmem>>, vector<8x2xf32>
    %c8 = arith.constant 8 : index
    %c0_1 = arith.constant 0 : index
    %1 = vector.load %arg3[%c8, %c0_1] : memref<24x2xf32, #tpu.memory_space<vmem>>, vector<8x2xf32>
    %c16 = arith.constant 16 : index
    %c0_2 = arith.constant 0 : index
    %2 = vector.load %arg3[%c16, %c0_2] : memref<24x2xf32, #tpu.memory_space<vmem>>, vector<8x2xf32>
    %c0_3 = arith.constant 0 : index
    %c0_4 = arith.constant 0 : index
    %3 = memref.load %arg1[%c0_3, %c0_4] : memref<3x3xf32, #tpu.memory_space<smem>>
    %4 = vector.broadcast %3 : f32 to vector<8x2xf32>
    %5 = arith.mulf %0, %4 : vector<8x2xf32>
    %c0_5 = arith.constant 0 : index
    %c1 = arith.constant 1 : index
    %6 = memref.load %arg1[%c0_5, %c1] : memref<3x3xf32, #tpu.memory_space<smem>>
    %7 = vector.broadcast %6 : f32 to vector<8x2xf32>
    %8 = arith.mulf %1, %7 : vector<8x2xf32>
    %9 = arith.addf %5, %8 : vector<8x2xf32>
    %c0_6 = arith.constant 0 : index
    %c2 = arith.constant 2 : index
    %10 = memref.load %arg1[%c0_6, %c2] : memref<3x3xf32, #tpu.memory_space<smem>>
    %11 = vector.broadcast %10 : f32 to vector<8x2xf32>
    %12 = arith.mulf %2, %11 : vector<8x2xf32>
    %13 = arith.addf %9, %12 : vector<8x2xf32>
    %c0_7 = arith.constant 0 : index
    %14 = memref.load %arg2[%c0_7] : memref<3xf32, #tpu.memory_space<smem>>
    %15 = vector.broadcast %14 : f32 to vector<8x2xf32>
    %16 = arith.addf %13, %15 : vector<8x2xf32>
    %c0_8 = arith.constant 0 : index
    %c0_9 = arith.constant 0 : index
    %17 = vector.load %arg4[%c0_8, %c0_9] : memref<24x2xf32, #tpu.memory_space<vmem>>, vector<8x2xf32>
    tpu.vector_store %arg4[%c0_8, %c0_9], %16 {strides = array<i32>} : memref<24x2xf32, #tpu.memory_space<vmem>>, vector<8x2xf32>,
    %c1_10 = arith.constant 1 : index
    %c0_11 = arith.constant 0 : index
    %18 = memref.load %arg1[%c1_10, %c0_11] : memref<3x3xf32, #tpu.memory_space<smem>>
    %19 = vector.broadcast %18 : f32 to vector<8x2xf32>
    %20 = arith.mulf %0, %19 : vector<8x2xf32>
    %c1_12 = arith.constant 1 : index
    %c1_13 = arith.constant 1 : index
    %21 = memref.load %arg1[%c1_12, %c1_13] : memref<3x3xf32, #tpu.memory_space<smem>>
    %22 = vector.broadcast %21 : f32 to vector<8x2xf32>
    %23 = arith.mulf %1, %22 : vector<8x2xf32>
    %24 = arith.addf %20, %23 : vector<8x2xf32>
    %c1_14 = arith.constant 1 : index
    %c2_15 = arith.constant 2 : index
    %25 = memref.load %arg1[%c1_14, %c2_15] : memref<3x3xf32, #tpu.memory_space<smem>>
    %26 = vector.broadcast %25 : f32 to vector<8x2xf32>
    %27 = arith.mulf %2, %26 : vector<8x2xf32>
    %28 = arith.addf %24, %27 : vector<8x2xf32>
    %c1_16 = arith.constant 1 : index
    %29 = memref.load %arg2[%c1_16] : memref<3xf32, #tpu.memory_space<smem>>
    %30 = vector.broadcast %29 : f32 to vector<8x2xf32>
    %31 = arith.addf %28, %30 : vector<8x2xf32>
    %c8_17 = arith.constant 8 : index
    %c0_18 = arith.constant 0 : index
    %32 = vector.load %arg4[%c8_17, %c0_18] : memref<24x2xf32, #tpu.memory_space<vmem>>, vector<8x2xf32>
    tpu.vector_store %arg4[%c8_17, %c0_18], %31 {strides = array<i32>} : memref<24x2xf32, #tpu.memory_space<vmem>>, vector<8x2xf32>,
    %c2_19 = arith.constant 2 : index
    %c0_20 = arith.constant 0 : index
    %33 = memref.load %arg1[%c2_19, %c0_20] : memref<3x3xf32, #tpu.memory_space<smem>>
    %34 = vector.broadcast %33 : f32 to vector<8x2xf32>
    %35 = arith.mulf %0, %34 : vector<8x2xf32>
    %c2_21 = arith.constant 2 : index
    %c1_22 = arith.constant 1 : index
    %36 = memref.load %arg1[%c2_21, %c1_22] : memref<3x3xf32, #tpu.memory_space<smem>>
    %37 = vector.broadcast %36 : f32 to vector<8x2xf32>
    %38 = arith.mulf %1, %37 : vector<8x2xf32>
    %39 = arith.addf %35, %38 : vector<8x2xf32>
    %c2_23 = arith.constant 2 : index
    %c2_24 = arith.constant 2 : index
    %40 = memref.load %arg1[%c2_23, %c2_24] : memref<3x3xf32, #tpu.memory_space<smem>>
    %41 = vector.broadcast %40 : f32 to vector<8x2xf32>
    %42 = arith.mulf %2, %41 : vector<8x2xf32>
    %43 = arith.addf %39, %42 : vector<8x2xf32>
    %c2_25 = arith.constant 2 : index
    %44 = memref.load %arg2[%c2_25] : memref<3xf32, #tpu.memory_space<smem>>
    %45 = vector.broadcast %44 : f32 to vector<8x2xf32>
    %46 = arith.addf %43, %45 : vector<8x2xf32>
    %c16_26 = arith.constant 16 : index
    %c0_27 = arith.constant 0 : index
    %47 = vector.load %arg4[%c16_26, %c0_27] : memref<24x2xf32, #tpu.memory_space<vmem>>, vector<8x2xf32>
    tpu.vector_store %arg4[%c16_26, %c0_27], %46 {strides = array<i32>} : memref<24x2xf32, #tpu.memory_space<vmem>>, vector<8x2xf32>,
    return
  }
  func.func @transform_0(%arg0: i32) -> (i32, i32) {
    %c0_i32 = arith.constant 0 : i32
    %c0_i32_0 = arith.constant 0 : i32
    %c0_i32_1 = arith.constant 0 : i32
    return %c0_i32, %c0_i32_0 : i32, i32
  }
  func.func @transform_1(%arg0: i32) -> i32 {
    %c0_i32 = arith.constant 0 : i32
    %c0_i32_0 = arith.constant 0 : i32
    return %c0_i32 : i32
  }
  func.func @transform_2(%arg0: i32) -> (i32, i32) {
    %c0_i32 = arith.constant 0 : i32
    %c0_i32_0 = arith.constant 0 : i32
    return %c0_i32, %arg0 : i32, i32
  }
  func.func @transform_3(%arg0: i32) -> (i32, i32) {
    %c0_i32 = arith.constant 0 : i32
    %c0_i32_0 = arith.constant 0 : i32
    return %c0_i32, %arg0 : i32, i32
  }
}

</mosaic_0001>

<bundles_post_ra>
// kernel: tpu_custom_call.1
= control target key start
LH: loop header
LB: loop body
LE: loop exit
PB: predicated region body
PF: predicated region fallthrough
CT: control target
= control target key end

     0   :  { %8 = vsyncpa [#allocation3], 0  ;;  %s183_s0 = inlined_call_operand.vmem [shape: f32[3,3], index: 0, kind: input, shape index: {}]   ;;  %s184_s1 = inlined_call_operand.vmem [shape: f32[3], index: 1, kind: input, shape index: {}]   ;;  %s185_s2 = inlined_call_operand.vmem [shape: f32[24,2], index: 2, kind: input, shape index: {}]   ;;  %s186_s3 = inlined_call_operand.vmem [shape: f32[24,2], index: 3, kind: output, shape index: {}]  }
   0x1   :  { %s16_s14 = sshll.u32 %s183_s0, 4  ;;  %s17_s14 = int_to_ptr.vmem [resolvable:$true] %s16_s14 }
   0x2   :  { %9 = vsyncpa [#allocation5], 0  ;;  %s26_s17 = sshll.u32 %s184_s1, 4  ;;  %s106_s18 = scalar_lea.vmem %s17_s14, 64  ;;  %s27_s17 = int_to_ptr.vmem [resolvable:$true] %s26_s17 }
   0x3   :  { %p107_p0 = scmp.ne.s32.totalorder %s17_s14, %s106_s18  ;;  %p111_p1 = scmp.lt.s32.totalorder %s17_s14, %s17_s14 }
   0x4   :  { %p112_p2 = scmp.lt.s32.totalorder %s106_s18, %s106_s18 }
   0x6   :  { %p113_p3 = por %p112_p2, %p111_p1 }
   0x8   :  { %p114_p4 = pnand %p113_p3, %p107_p0 }
   0xa   :  { %117 = shalt.err (!%p114_p4)
}
   0xb   :  { %s134_s19 = smov [#allocation2]   ;;  %s118_s20 = scalar_lea.vmem %s27_s17, 16 }
   0xc   :  { %19 = dma.vmem_to_smem %s17_s14, 64, %s134_s19, [#allocation3]  }
   0xd   :  { %p119_p5 = scmp.ne.s32.totalorder %s27_s17, %s118_s20  ;;  %p123_p6 = scmp.lt.s32.totalorder %s27_s17, %s27_s17 }
   0xe   :  { %p124_p7 = scmp.lt.s32.totalorder %s118_s20, %s118_s20 }
  0x10   :  { %p125_p8 = por %p124_p7, %p123_p6 }
  0x12   :  { %p126_p9 = pnand %p125_p8, %p119_p5 }
  0x14   :  { %129 = shalt.err (!%p126_p9)
}
  0x15   :  { %s135_s0 = smov [#allocation4]  }
  0x16   :  { %29 = dma.vmem_to_smem %s27_s17, 16, %s135_s0, [#allocation5]  }
  0x17   :  { %130 = dma.done.wait [#allocation3], 64  }
  0x18   :  { %131 = vsyncadd [#allocation3], 4294967232 }
  0x19   :  { %132 = dma.done.wait [#allocation5], 16  }
  0x1a   :  { %133 = vsyncadd [#allocation5], 4294967280 }
  0x1b   :  { %38 = sfence }
  0x1c   :  { %s42_s1 = sld [smem:[#allocation2]]  ;;  %v39_v0 = vld [vmem:[%s185_s2] sm:$0xff]  ;;  %v40_v1 = vld [vmem:[%s185_s2 + $0x8] sm:$0xff]  ;;  %v41_v2 = vld [vmem:[%s185_s2 + $0x10] sm:$0xff]  ;;  %vm56_vm0 = vcmask 15360  }
  0x1d   :  { %s94_s21 = sld [smem:[#allocation2 + $0x1]] }
  0x1e   :  { %s95_s22 = sld [smem:[#allocation2 + $0x2]] }
  0x1f   :  { %s53_s23 = sld [smem:[#allocation4]] }
  0x20   :  { %s96_s26 = sld [smem:[#allocation2 + $0x80]] }
  0x21   :  { %s97_s29 = sld [smem:[#allocation2 + $0x81]] }
  0x22   :  { %v43_v3 = vstv %s42_s1  ;;  %s98_s5 = sld [smem:[#allocation2 + $0x82]] }
  0x23   :  { %v44_v4 = vmul.f32 %v43_v3, %v39_v0  ;;  %v46_v5 = vstv %s94_s21  ;;  %s99_s6 = sld [smem:[#allocation4 + $0x1]] }
  0x24   :  { %v47_v6 = vmul.f32 %v46_v5, %v40_v1  ;;  %v50_v7 = vstv %s95_s22  ;;  %s100_s7 = sld [smem:[#allocation2 + $0x100]] }
  0x25   :  { %v51_v8 = vmul.f32 %v50_v7, %v41_v2  ;;  %s101_s8 = sld [smem:[#allocation2 + $0x101]]  ;;  %v54_v11 = vstv %s53_s23 }
  0x26   :  { %v48_v9 = vadd.f32 %v47_v6, %v44_v4  ;;  %v59_v10 = vstv %s96_s26  ;;  %s102_s9 = sld [smem:[#allocation2 + $0x102]] }
  0x27   :  { %v60_v12 = vmul.f32 %v59_v10, %v39_v0  ;;  %v62_v13 = vstv %s97_s29  ;;  %s103_s10 = sld [smem:[#allocation4 + $0x2]] }
  0x28   :  { %v52_v14 = vadd.f32 %v51_v8, %v48_v9  ;;  %v63_v15 = vmul.f32 %v62_v13, %v40_v1  ;;  %v66_v16 = vstv %s98_s5 }
  0x29   :  { %v67_v17 = vmul.f32 %v66_v16, %v41_v2  ;;  %v70_v21 = vstv %s99_s6 }
  0x2a   :  { %v55_v18 = vadd.f32 %v54_v11, %v52_v14  ;;  %v64_v19 = vadd.f32 %v63_v15, %v60_v12  ;;  %v74_v20 = vstv %s100_s7 }
  0x2b   :  { %v75_v22 = vmul.f32 %v74_v20, %v39_v0  ;;  %v77_v23 = vstv %s101_s8 }
  0x2c   :  { %57 = vst.msk [vmem:[%s186_s3] sm:$0xff] %vm56_vm0, %v55_v18  ;;  %v68_v24 = vadd.f32 %v67_v17, %v64_v19  ;;  %v78_v25 = vmul.f32 %v77_v23, %v40_v1  ;;  %v81_v26 = vstv %s102_s9 }
  0x2d   :  { %v82_v27 = vmul.f32 %v81_v26, %v41_v2  ;;  %v85_v30 = vstv %s103_s10 }
  0x2e   :  { %v71_v28 = vadd.f32 %v70_v21, %v68_v24  ;;  %v79_v29 = vadd.f32 %v78_v25, %v75_v22 }
  0x30   :  { %72 = vst.msk [vmem:[%s186_s3 + $0x8] sm:$0xff] %vm56_vm0, %v71_v28  ;;  %v83_v31 = vadd.f32 %v82_v27, %v79_v29 }
  0x32   :  { %v86_v32 = vadd.f32 %v85_v30, %v83_v31 }
  0x34   :  { %87 = vst.msk [vmem:[%s186_s3 + $0x10] sm:$0xff] %vm56_vm0, %v86_v32 }
  0x35   :  { %92 = vsyncpa [#allocation3], 1 }
  0x36   :  { %93 = vsyncpa [#allocation5], 1 }

</bundles_post_ra>
